<compile_context>
chip_gen: v7x
topology: tpu7x:2x2x1
jax: 0.10.0
libtpu: 0.0.40
codegen_flags: <defaults>
</compile_context>

<pallas_src>
import functools

import jax
import jax.numpy as jnp
from jax import lax
from jax.experimental import pallas as pl
from jax.experimental.pallas import tpu as pltpu


_TARGET_BLOCK_BYTES = 2 << 20      # ~2 MiB of input per grid step (mem-bound op)
_MAX_LANE_TILE = 32 * 1024         # cap on tokens (lanes) per step
_VMEM_LIMIT_BYTES = 48 << 20       # < v7x 64 MiB physical, > v5e 16 MiB default scope


def _round_up(x, m):
    return ((x + m - 1) // m) * m


def _choose_lane_tile(L, C, itemsize):
    """Lane (token) tile: multiple of 128, big enough to amortize per-step cost.

    Prefers an exact 128-multiple divisor of L (no padding); refuses degenerate
    tiny divisors (pads instead); pads when L is not a multiple of 128.
    """
    want = _TARGET_BLOCK_BYTES // (C * itemsize)
    want = max(128, min(want, _MAX_LANE_TILE))
    want -= want % 128
    L128 = _round_up(L, 128)
    if L128 <= want:                       # whole token axis fits in one lane tile
        return L128
    if L % 128 == 0:
        t, floor = want, max(128, want // 4)
        while t >= floor:                  # largest "big-enough" exact divisor
            if L % t == 0:
                return t
            t -= 128
    return want                            # no nice divisor: wrapper pads L up


# ----------------------------------------------------------------------------
# Pallas kernel
# ----------------------------------------------------------------------------
def _layernorm_kernel(x_ref, w_ref, b_ref, o_ref, *, eps, chunk):
    """Block: x (1, C, Lt). Normalize over C (sublanes); tokens live in lanes.

    Compute is sub-tiled in `chunk`-lane slices so f32 intermediates stay in
    vregs rather than becoming whole-block VMEM temporaries.
    """
    n_chunks = x_ref.shape[-1] // chunk
    w = w_ref[...]                                                # (C, 1) f32
    b = b_ref[...]                                                # (C, 1) f32

    def body(c, carry):
        off = pl.multiple_of(c * chunk, chunk)                    # aligned lane start
        x = x_ref[0, :, pl.ds(off, chunk)].astype(jnp.float32)    # (C, chunk)
        mu = jnp.mean(x, axis=0, keepdims=True)                   # per-token mean
        xc = x - mu
        var = jnp.mean(xc * xc, axis=0, keepdims=True)            # biased (unbiased=False)
        inv = lax.rsqrt(var + eps)                                # EUP slot
        y = xc * inv * w + b
        o_ref[0, :, pl.ds(off, chunk)] = y.astype(o_ref.dtype)
        return carry

    lax.fori_loop(0, n_chunks, body, 0, unroll=min(n_chunks, 8))


# ----------------------------------------------------------------------------
# Wrapper (PyTorch `LayerNorm(dim)` equivalent: per-(b,h,w) LN over C, NCHW in/out)
# ----------------------------------------------------------------------------
def layer_norm_nchw(x, w, b, eps=1e-5):
    B, C, H, W = x.shape
    L = H * W
    itemsize = jnp.dtype(x.dtype).itemsize

    lt = _choose_lane_tile(L, C, itemsize)
    Lp = _round_up(L, lt)
    n_tiles = Lp // lt

    # v7x has 2 TensorCores: make sure at least one parallel axis has >= 2 blocks.
    if B == 1 and n_tiles == 1 and lt >= 256:
        lt = _round_up(lt // 2, 128)
        Lp = _round_up(L, lt)
        n_tiles = Lp // lt

    # Free reshape (no transpose). Keep activations in their HBM dtype (bf16 stays bf16).
    x3 = x.reshape(B, C, L)
    if Lp != L:
        x3 = jnp.pad(x3, ((0, 0), (0, 0), (0, Lp - L)))   # padded tokens sliced off below

    w2 = w.reshape(C, 1).astype(jnp.float32)
    b2 = b.reshape(C, 1).astype(jnp.float32)

    # Inner compute sub-tile (keeps per-slice intermediates within the 64 vregs).
    if lt <= 512:
        chunk = lt
    else:
        chunk = next(c for c in (512, 256, 128) if lt % c == 0)

    kern = functools.partial(_layernorm_kernel, eps=eps, chunk=chunk)
    out = pl.pallas_call(
        kern,
        grid=(B, n_tiles),
        in_specs=[
            pl.BlockSpec((1, C, lt), lambda i, j: (i, 0, j)),   # lane-dense tokens
            pl.BlockSpec((C, 1), lambda i, j: (0, 0)),          # weight (resident)
            pl.BlockSpec((C, 1), lambda i, j: (0, 0)),          # bias   (resident)
        ],
        out_specs=pl.BlockSpec((1, C, lt), lambda i, j: (i, 0, j)),
        out_shape=jax.ShapeDtypeStruct((B, C, Lp), x.dtype),
        compiler_params=pltpu.CompilerParams(
            dimension_semantics=("parallel", "parallel"),       # megacore on v7x
            vmem_limit_bytes=_VMEM_LIMIT_BYTES),
    )(x3, w2, b2)

    if Lp != L:
        out = out[:, :, :L]
    return out.reshape(B, C, H, W)


# ----------------------------------------------------------------------------
# Pure-JAX reference (mirrors the PyTorch module exactly)
# ----------------------------------------------------------------------------
def layer_norm_ref(x, w, b, eps=1e-5):
    B, C, H, W = x.shape
    xt = x.transpose(0, 2, 3, 1).reshape(B, H * W, C)
    mu = jnp.mean(xt, axis=-1, keepdims=True)
    var = jnp.mean(jnp.square(xt - mu), axis=-1, keepdims=True)
    y = (xt - mu) / jnp.sqrt(var + eps) * w + b
    return y.reshape(B, H, W, C).transpose(0, 3, 1, 2)


# ----------------------------------------------------------------------------
# main
# ----------------------------------------------------------------------------
if __name__ == "__main__":
    B, C, H, W = 2, 16, 16, 16
    key = jax.random.PRNGKey(0)
    kx, kw, kb = jax.random.split(key, 3)
    x = jax.random.normal(kx, (B, C, H, W), jnp.float32)
    # PyTorch inits weight=1, bias=0; perturb slightly to exercise the affine path.
    w = 1.0 + 0.1 * jax.random.normal(kw, (C,), jnp.float32)
    b = 0.1 * jax.random.normal(kb, (C,), jnp.float32)

    fwd = jax.jit(layer_norm_nchw)
    out = jax.block_until_ready(fwd(x, w, b))
    ref = layer_norm_ref(x, w, b)

    assert out.shape == (B, C, H, W), out.shape
    assert bool(jnp.all(jnp.isfinite(out)))
    err = float(jnp.max(jnp.abs(out - ref)))
    assert bool(jnp.allclose(out, ref, rtol=1e-4, atol=1e-4)), err
    print("KERNEL_OK")
</pallas_src>

<mosaic_0001>
module attributes {stable_mosaic.version = 11 : i64} {
  func.func @_layernorm_kernel(%arg0: i32, %arg1: i32, %arg2: memref<1x16x256xf32, #tpu.memory_space<vmem>>, %arg3: memref<16x1xf32, #tpu.memory_space<vmem>>, %arg4: memref<16x1xf32, #tpu.memory_space<vmem>>, %arg5: memref<1x16x256xf32, #tpu.memory_space<vmem>>) attributes {dimension_semantics = [#tpu.dimension_semantics<parallel>, #tpu.dimension_semantics<parallel>], iteration_bounds = array<i64: 2, 1>, scalar_prefetch = 0 : i64, scratch_operands = 0 : i64, tpu.core_type = #tpu.core_type<tc>, window_params = [{transform_indices = @transform_0, window_bounds = array<i64: 1, 16, 256>}, {pipeline_mode = #tpu.pipeline_mode<synchronous>, transform_indices = @transform_1, window_bounds = array<i64: 16, 1>}, {pipeline_mode = #tpu.pipeline_mode<synchronous>, transform_indices = @transform_2, window_bounds = array<i64: 16, 1>}, {transform_indices = @transform_3, window_bounds = array<i64: 1, 16, 256>}]} {
    %c0 = arith.constant 0 : index
    %c0_0 = arith.constant 0 : index
    %0 = vector.load %arg3[%c0, %c0_0] : memref<16x1xf32, #tpu.memory_space<vmem>>, vector<16x1xf32>
    %c0_1 = arith.constant 0 : index
    %c0_2 = arith.constant 0 : index
    %1 = vector.load %arg4[%c0_1, %c0_2] : memref<16x1xf32, #tpu.memory_space<vmem>>, vector<16x1xf32>
    %c0_i32 = arith.constant 0 : i32
    %c256_i32 = arith.constant 256 : i32
    %2 = arith.muli %c0_i32, %c256_i32 : i32
    %3 = tpu.assume_multiple %2, 256 : i32
    %c0_3 = arith.constant 0 : index
    %c0_4 = arith.constant 0 : index
    %4 = arith.index_cast %3 : i32 to index
    %5 = vector.load %arg2[%c0_3, %c0_4, %4] : memref<1x16x256xf32, #tpu.memory_space<vmem>>, vector<1x16x256xf32>
    %6 = vector.shape_cast %5 : vector<1x16x256xf32> to vector<16x256xf32>
    %cst = arith.constant dense<0.000000e+00> : vector<256xf32>
    %7 = vector.multi_reduction <add>, %6, %cst [0] : vector<16x256xf32> to vector<256xf32>
    %8 = vector.shape_cast %7 : vector<256xf32> to vector<1x256xf32>
    %cst_5 = arith.constant 1.600000e+01 : f32
    %9 = vector.broadcast %cst_5 : f32 to vector<1x256xf32>
    %10 = arith.divf %8, %9 : vector<1x256xf32>
    %11 = vector.broadcast %10 : vector<1x256xf32> to vector<16x256xf32>
    %12 = arith.subf %6, %11 : vector<16x256xf32>
    %13 = arith.mulf %12, %12 : vector<16x256xf32>
    %cst_6 = arith.constant dense<0.000000e+00> : vector<256xf32>
    %14 = vector.multi_reduction <add>, %13, %cst_6 [0] : vector<16x256xf32> to vector<256xf32>
    %15 = vector.shape_cast %14 : vector<256xf32> to vector<1x256xf32>
    %cst_7 = arith.constant 1.600000e+01 : f32
    %16 = vector.broadcast %cst_7 : f32 to vector<1x256xf32>
    %17 = arith.divf %15, %16 : vector<1x256xf32>
    %cst_8 = arith.constant 9.99999974E-6 : f32
    %18 = vector.broadcast %cst_8 : f32 to vector<1x256xf32>
    %19 = arith.addf %17, %18 : vector<1x256xf32>
    %20 = math.rsqrt %19 : vector<1x256xf32>
    %21 = vector.broadcast %20 : vector<1x256xf32> to vector<16x256xf32>
    %22 = arith.mulf %12, %21 : vector<16x256xf32>
    %23 = vector.broadcast %0 : vector<16x1xf32> to vector<16x256xf32>
    %24 = arith.mulf %22, %23 : vector<16x256xf32>
    %25 = vector.broadcast %1 : vector<16x1xf32> to vector<16x256xf32>
    %26 = arith.addf %24, %25 : vector<16x256xf32>
    %c0_9 = arith.constant 0 : index
    %c0_10 = arith.constant 0 : index
    %27 = arith.index_cast %3 : i32 to index
    %28 = vector.load %arg5[%c0_9, %c0_10, %27] : memref<1x16x256xf32, #tpu.memory_space<vmem>>, vector<1x16x256xf32>
    %29 = vector.shape_cast %28 : vector<1x16x256xf32> to vector<16x256xf32>
    %30 = vector.shape_cast %26 : vector<16x256xf32> to vector<1x16x256xf32>
    tpu.vector_store %arg5[%c0_9, %c0_10, %27], %30 {strides = array<i32>} : memref<1x16x256xf32, #tpu.memory_space<vmem>>, vector<1x16x256xf32>,
    %c1_i32 = arith.constant 1 : i32
    return
  }
  func.func @transform_0(%arg0: i32, %arg1: i32) -> (i32, i32, i32) {
    %c0_i32 = arith.constant 0 : i32
    %c0_i32_0 = arith.constant 0 : i32
    return %arg0, %c0_i32, %arg1 : i32, i32, i32
  }
  func.func @transform_1(%arg0: i32, %arg1: i32) -> (i32, i32) {
    %c0_i32 = arith.constant 0 : i32
    %c0_i32_0 = arith.constant 0 : i32
    %c0_i32_1 = arith.constant 0 : i32
    return %c0_i32, %c0_i32_0 : i32, i32
  }
  func.func @transform_2(%arg0: i32, %arg1: i32) -> (i32, i32) {
    %c0_i32 = arith.constant 0 : i32
    %c0_i32_0 = arith.constant 0 : i32
    %c0_i32_1 = arith.constant 0 : i32
    return %c0_i32, %c0_i32_0 : i32, i32
  }
  func.func @transform_3(%arg0: i32, %arg1: i32) -> (i32, i32, i32) {
    %c0_i32 = arith.constant 0 : i32
    %c0_i32_0 = arith.constant 0 : i32
    return %arg0, %c0_i32, %arg1 : i32, i32, i32
  }
}

</mosaic_0001>

<bundles_post_ra>
// kernel: layer_norm_nchw.1
= control target key start
LH: loop header
LB: loop body
LE: loop exit
PB: predicated region body
PF: predicated region fallthrough
CT: control target
= control target key end

     0   :  { %s475_s12 = smov 0   ;;  %s477_s13 = smov 0   ;;  %s527_s0 = inlined_call_operand.vmem [shape: f32[2,16,256], index: 0, kind: input, shape index: {}]   ;;  %s528_s1 = inlined_call_operand.vmem [shape: f32[16,1], index: 1, kind: input, shape index: {}]   ;;  %s529_s2 = inlined_call_operand.vmem [shape: f32[16,1], index: 2, kind: input, shape index: {}]   ;;  %s530_s3 = inlined_call_operand.vmem [shape: f32[2,16,256], index: 3, kind: output, shape index: {}]  }
   0x1   :  { %s479_s14 = smov 0  }
   0x2 LB: > { %s25_s15 = sadd.s32 1, %s448_s13  ;;  %p390_p0 = scmp.ge.s32.totalorder %s452_s14, 1  ;;  %s452_s14 = sphi %s479_s14, %s13_s14   ;;  %s448_s13 = sphi %s477_s13, %s532_s13   ;;  %s444_s12 = sphi %s475_s12, %s531_s12  }
   0x3   : > { %p27_p1 = scmp.ge.s32.totalorder %s25_s15, 2  ;;  %p158_p2 = scmp.lt.s32.totalorder %s452_s14, 3 }
   0x5   : > { %s534_s15 = smov (%p27_p1, %s25_s15), 0  ;;  %p159_p3 = pnand %p390_p0, %p158_p2 }
   0x6   : > { %v212_v0 = vld [vmem:[%s529_s2] sm:$0xff] (!%p159_p3)  ;;  %v454_v2 = vmov (!%p159_p3), 0   ;;  %v213_v3 = vld [vmem:[%s529_s2 + $0x8] sm:$0xff] (!%p159_p3)  ;;  %p191_p4 = scmp.lt.s32.totalorder (!%p159_p3), %s444_s12, 1 }
   0x7   : > { %162 = sbr.rel (%p159_p3) target bundleno = 145 (0x91), region = 32  ;;  %v210_v1 = vld [vmem:[%s528_s1] sm:$0xff] (!%p159_p3)  ;;  %425 = vset.pattern.permute.xlu1 (!%p159_p3), %v454_v2  ;;  %424 = vset.pattern.permute.xlu0 (!%p159_p3), %v454_v2  ;;  %v211_v4 = vld [vmem:[%s528_s1 + $0x8] sm:$0xff] (!%p159_p3) }
   0x8   : > { %283 = vperm.xlu1 (!%p159_p3), %425, %v212_v0   ;;  %269 = vperm.xlu0 (!%p159_p3), %424, %v210_v1  }
   0xc   : > { %288 = vperm.xlu1 (!%p159_p3), %425, %v213_v3   ;;  %274 = vperm.xlu0 (!%p159_p3), %424, %v211_v4  }
   0xe   : > { %s536_s12 = smov (!%p191_p4, %s444_s12), 1 }
   0xf   : > { %s397_s24 = sshll.u32 %s536_s12, 5 }
  0x10   : > { %s198_s27 = scalar_lea.vmem %s527_s0, %s397_s24  ;;  %s208_s30 = scalar_lea.vmem %s530_s3, %s397_s24 }
  0x11   : > { %v214_v5 = vld [vmem:[%s198_s27] sm:$0xff]  ;;  %v216_v6 = vld [vmem:[%s198_s27 + $0x10] sm:$0xff]  ;;  %v215_v7 = vld [vmem:[%s198_s27 + $0x8] sm:$0xff] }
  0x12   : > { %v217_v8 = vld [vmem:[%s198_s27 + $0x18] sm:$0xff]  ;;  %v218_v9 = vadd.f32 %v216_v6, %v214_v5 }
  0x13   : > { %v225_v10 = vadd.f32 %v217_v8, %v215_v7 }
  0x14   : > { %v219_v11 = vrot.slane %v218_v9, 4 }
  0x15   : > { %v226_v12 = vrot.slane %v225_v10, 4 }
  0x16   : > { %v220_v13 = vadd.f32 %v219_v11, %v218_v9 }
  0x17   : > { %v227_v14 = vadd.f32 %v226_v12, %v225_v10 }
  0x18   : > { %v221_v15 = vrot.slane %v220_v13, 2 }
  0x19   : > { %v228_v16 = vrot.slane %v227_v14, 2 }
  0x1a   : > { %v222_v17 = vadd.f32 %v221_v15, %v220_v13 }
  0x1b   : > { %v229_v18 = vadd.f32 %v228_v16, %v227_v14 }
  0x1c   : > { %v223_v19 = vrot.slane %v222_v17, 1 }
  0x1d   : > { %v230_v20 = vrot.slane %v229_v18, 1 }
  0x1e   : > { %v224_v21 = vadd.f32 %v223_v19, %v222_v17 }
  0x1f   : > { %v231_v22 = vadd.f32 %v230_v20, %v229_v18 }
  0x20   : > { %v233_v23 = vmul.f32 0.0625, %v224_v21 }
  0x21   : > { %v234_v24 = vmul.f32 0.0625, %v231_v22 }
  0x22   : > { %v235_v25 = vsub.f32 %v214_v5, %v233_v23  ;;  %v237_v26 = vsub.f32 %v216_v6, %v233_v23 }
  0x23   : > { %v236_v27 = vsub.f32 %v215_v7, %v234_v24  ;;  %v238_v28 = vsub.f32 %v217_v8, %v234_v24 }
  0x24   : > { %v239_v29 = vmul.f32 %v235_v25, %v235_v25  ;;  %v241_v30 = vmul.f32 %v237_v26, %v237_v26 }
  0x25   : > { %v240_v31 = vmul.f32 %v236_v27, %v236_v27  ;;  %v242_v32 = vmul.f32 %v238_v28, %v238_v28 }
  0x26   : > { %v243_v33 = vadd.f32 %v241_v30, %v239_v29 }
  0x27   : > { %v250_v34 = vadd.f32 %v242_v32, %v240_v31 }
  0x28   : > { %v244_v35 = vrot.slane %v243_v33, 4 }
  0x29   : > { %v251_v36 = vrot.slane %v250_v34, 4 }
  0x2a   : > { %v245_v37 = vadd.f32 %v244_v35, %v243_v33 }
  0x2b   : > { %v252_v38 = vadd.f32 %v251_v36, %v250_v34 }
  0x2c   : > { %v246_v39 = vrot.slane %v245_v37, 2 }
  0x2d   : > { %v253_v40 = vrot.slane %v252_v38, 2 }
  0x2e   : > { %v247_v41 = vadd.f32 %v246_v39, %v245_v37 }
  0x2f   : > { %v254_v42 = vadd.f32 %v253_v40, %v252_v38 }
  0x30   : > { %v248_v43 = vrot.slane %v247_v41, 1 }
  0x31   : > { %v255_v44 = vrot.slane %v254_v42, 1 }
  0x32   : > { %v249_v45 = vadd.f32 %v248_v43, %v247_v41 }
  0x33   : > { %v256_v46 = vadd.f32 %v255_v44, %v254_v42 }
  0x34   : > { %v257_v47 = vmul.f32 0.0625, %v249_v45 }
  0x35   : > { %v258_v48 = vmul.f32 0.0625, %v256_v46 }
  0x36   : > { %v259_v49 = vadd.f32 1e-05, %v257_v47 }
  0x37   : > { %v260_v50 = vadd.f32 1e-05, %v258_v48 }
  0x38   : > { %426 = vrsqrt.f32 %v259_v49 }
  0x39   : > { %428 = vrsqrt.f32 %v260_v50 }
  0x42   : > { %v427_v51 = vpop.eup %426 }
  0x43   : > { %v429_v52 = vpop.eup %428  ;;  %v263_v53 = vmul.f32 %v427_v51, %v235_v25  ;;  %v265_v59 = vmul.f32 %v427_v51, %v237_v26 }
  0x44   : > { %v264_v54 = vmul.f32 %v429_v52, %v236_v27  ;;  %v266_v60 = vmul.f32 %v429_v52, %v238_v28 }
  0x87   : > { %v284_v55 = vpop.permute.xlu1 %283  ;;  %v270_v56 = vpop.permute.xlu0 %269 }
  0x88   : > { %v277_v57 = vmul.f32 %v270_v56, %v263_v53  ;;  %v278_v58 = vmul.f32 %v270_v56, %v264_v54 }
  0x8a   : > { %v291_v61 = vadd.f32 %v284_v55, %v277_v57  ;;  %v292_v62 = vadd.f32 %v284_v55, %v278_v58 }
  0x8b   : > { %v275_v63 = vpop.permute.xlu0 %274  ;;  %v289_v2 = vpop.permute.xlu1 %288 }
  0x8c   : > { %295 = vst [vmem:[%s208_s30] sm:$0xff] %v291_v61  ;;  %296 = vst [vmem:[%s208_s30 + $0x8] sm:$0xff] %v292_v62  ;;  %v279_v0 = vmul.f32 %v275_v63, %v265_v59  ;;  %v280_v1 = vmul.f32 %v275_v63, %v266_v60 }
  0x8e   : > { %v293_v3 = vadd.f32 %v289_v2, %v279_v0  ;;  %v294_v4 = vadd.f32 %v289_v2, %v280_v1 }
  0x90   : > { %297 = vst [vmem:[%s208_s30 + $0x10] sm:$0xff] %v293_v3  ;;  %298 = vst [vmem:[%s208_s30 + $0x18] sm:$0xff] %v294_v4 }
  0x91 PF: > { %s13_s14 = sadd.s32 1, %s452_s14   ;;  %s531_s12 = smov %s448_s13 }
  0x92   : > { %p10_p5 = scmp.ge.s32.totalorder %s13_s14, 4   ;;  %s532_s13 = smov %s534_s15 }
  0x94   :  { %12 = sbr.rel (!%p10_p5) target bundleno = 2 (0x2), region = 62 }

</bundles_post_ra>
